<compile_context>
chip_gen: v6e
topology: v6e:2x2x1
jax: 0.10.0
libtpu: 0.0.40
codegen_flags: <defaults>
</compile_context>

<pallas_src>
import functools

import jax
import jax.numpy as jnp
from jax.experimental import pallas as pl
from jax.experimental.pallas import tpu as pltpu


def _round_up(x, m):
    return (x + m - 1) // m * m


# ----------------------------- Pallas kernel --------------------------------
def _meta_kernel(cont_ref, cat_ref, w1_ref, b1_ref, w2a_ref, folded_ref,
                 b2_ref, out_ref, *, voffs, sum_vocab):
    tb = cont_ref.shape[0]

    # ---- stage 1: h = relu(cont @ W1 + b1)  (bf16 MXU, f32 accumulate) ----
    h = jnp.dot(cont_ref[...], w1_ref[...],
                preferred_element_type=jnp.float32) + b1_ref[...]
    h = jnp.maximum(h, 0.0)

    # ---- fused embedding gather: combined one-hot over all vocabularies ----
    cat = cat_ref[...]                                        # (tb, n_cat) i32
    iota = jax.lax.broadcasted_iota(jnp.int32, (tb, sum_vocab), 1)
    oh_bool = None
    for j, off in enumerate(voffs):                           # static unroll
        hit = (cat[:, j:j + 1] + off) == iota                 # disjoint ranges
        oh_bool = hit if oh_bool is None else jnp.logical_or(oh_bool, hit)
    oh = jnp.where(oh_bool, 1.0, 0.0).astype(jnp.bfloat16)    # exact 0/1

    # ---- stage 2: relu(concat([h, emb]) @ W2 + b2), concat folded away ----
    y = (jnp.dot(h.astype(jnp.bfloat16), w2a_ref[...],
                 preferred_element_type=jnp.float32)
         + jnp.dot(oh, folded_ref[...], preferred_element_type=jnp.float32)
         + b2_ref[...])
    out_ref[...] = jnp.maximum(y, 0.0).astype(out_ref.dtype)


# ------------------------------- wrapper -------------------------------------
@functools.partial(jax.jit, static_argnames=("block_batch",))
def meta_model_pallas(cont, cat, params, *, block_batch=512):
    """Forward pass matching MetaModel.forward(cont, cat) (activation=relu)."""
    assert block_batch % 8 == 0
    w1, b1, w2, b2 = params["w1"], params["b1"], params["w2"], params["b2"]
    emb_tables = params["emb_tables"]

    B, c_in = cont.shape
    n_cat = cat.shape[1]
    d1 = w1.shape[1]
    hd = w2.shape[1]
    cat = cat.astype(jnp.int32)

    vocabs = [int(t.shape[0]) for t in emb_tables]
    sum_vocab = sum(vocabs)
    voffs, off = [], 0
    for v in vocabs:
        voffs.append(off)
        off += v
    voffs = tuple(voffs)

    # Fold each embedding table into its slice of W2 (tiny, parameter-only):
    #   emb_i @ W2[d1+eoff_i : d1+eoff_i+e_i]  ==  onehot_i @ (T_i @ W2_slice_i)
    folded_parts, eoff = [], d1
    for tbl in emb_tables:
        e = tbl.shape[1]
        folded_parts.append(tbl @ w2[eoff:eoff + e, :])
        eoff += e
    folded = jnp.concatenate(folded_parts, axis=0)            # (sum_vocab, hd)

    # bf16 for everything the MXU touches; biases stay f32.
    cont_bf = cont.astype(jnp.bfloat16)
    w1_bf = w1.astype(jnp.bfloat16)
    w2a_bf = w2[:d1].astype(jnp.bfloat16)
    folded_bf = folded.astype(jnp.bfloat16)
    b1_2d = b1.reshape(1, -1).astype(jnp.float32)
    b2_2d = b2.reshape(1, -1).astype(jnp.float32)

    # Batch tiling: tile must be a multiple of 8; pad B up to a tile multiple.
    tb = min(block_batch, _round_up(B, 8))
    bp = _round_up(B, tb)
    if bp != B:
        cont_bf = jnp.pad(cont_bf, ((0, bp - B), (0, 0)))
        cat = jnp.pad(cat, ((0, bp - B), (0, 0)))     # index 0 is always valid
    grid = (bp // tb,)

    kernel = functools.partial(_meta_kernel, voffs=voffs, sum_vocab=sum_vocab)
    batched = lambda i: (i, 0)
    resident = lambda i: (0, 0)

    flops = 2 * bp * (c_in * d1 + d1 * hd + sum_vocab * hd)
    bytes_accessed = (bp * c_in * 2 + bp * n_cat * 4 + bp * hd * 4
                      + c_in * d1 * 2 + d1 * hd * 2 + sum_vocab * hd * 2
                      + (d1 + hd) * 4)

    out = pl.pallas_call(
        kernel,
        out_shape=jax.ShapeDtypeStruct((bp, hd), jnp.float32),
        grid=grid,
        in_specs=[
            pl.BlockSpec((tb, c_in), batched),        # cont   (streamed)
            pl.BlockSpec((tb, n_cat), batched),       # cat    (streamed)
            pl.BlockSpec((c_in, d1), resident),       # W1
            pl.BlockSpec((1, d1), resident),          # b1
            pl.BlockSpec((d1, hd), resident),         # W2[:d1]
            pl.BlockSpec((sum_vocab, hd), resident),  # folded embedding tables
            pl.BlockSpec((1, hd), resident),          # b2
        ],
        out_specs=pl.BlockSpec((tb, hd), batched),
        compiler_params=pltpu.CompilerParams(
            dimension_semantics=("parallel",),
            vmem_limit_bytes=32 * 1024 * 1024),
        cost_estimate=pl.CostEstimate(
            flops=flops, transcendentals=0, bytes_accessed=bytes_accessed),
    )(cont_bf, cat, w1_bf, b1_2d, w2a_bf, folded_bf, b2_2d)
    return out[:B]


# --------------------------- parameter construction --------------------------
def init_params(key, meta_cont_lens, meta_cat_lens, meta_hd):
    c_in, c_out = meta_cont_lens
    sum_e = sum(e for _, e in meta_cat_lens)
    ks = jax.random.split(key, 4 + len(meta_cat_lens))
    return {
        "w1": jax.random.normal(ks[0], (c_in, c_out), jnp.float32) * 0.1,
        "b1": jax.random.normal(ks[1], (c_out,), jnp.float32) * 0.1,
        "w2": jax.random.normal(ks[2], (c_out + sum_e, meta_hd), jnp.float32) * 0.1,
        "b2": jax.random.normal(ks[3], (meta_hd,), jnp.float32) * 0.1,
        "emb_tables": [
            jax.random.normal(ks[4 + i], (vocab, dim), jnp.float32)
            for i, (vocab, dim) in enumerate(meta_cat_lens)
        ],
    }


def reference_forward(cont, cat, params):
    """Plain-JAX f32 reference mirroring the torch module exactly."""
    h = jnp.maximum(cont @ params["w1"] + params["b1"], 0.0)
    embs = [tbl[cat[:, i]] for i, tbl in enumerate(params["emb_tables"])]
    x = jnp.concatenate([h] + embs, axis=1)
    return jnp.maximum(x @ params["w2"] + params["b2"], 0.0)


# ------------------------------------ main -----------------------------------
if __name__ == "__main__":
    meta_cont_lens = (16, 32)            # Linear(16 -> 32)
    meta_cat_lens = [(11, 8), (7, 4)]    # Embedding(11,8), Embedding(7,4)
    meta_hd = 32                         # Linear((32+8+4) -> 32)
    B = 64                               # small demo batch, 2 grid steps

    key = jax.random.PRNGKey(0)
    k_params, k_cont, k_cat = jax.random.split(key, 3)
    params = init_params(k_params, meta_cont_lens, meta_cat_lens, meta_hd)

    cont = jax.random.normal(k_cont, (B, meta_cont_lens[0]), jnp.float32)
    cat_cols = [
        jax.random.randint(jax.random.fold_in(k_cat, i), (B,), 0, vocab)
        for i, (vocab, _) in enumerate(meta_cat_lens)
    ]
    cat = jnp.stack(cat_cols, axis=1).astype(jnp.int32)      # (B, n_cat)

    out = meta_model_pallas(cont, cat, params, block_batch=32)   # grid=(2,)
    out = jax.block_until_ready(out)

    ref = reference_forward(cont, cat, params)
    assert out.shape == (B, meta_hd)
    # bf16 MXU inputs with f32 accumulation -> loosened tolerance vs f32 ref.
    assert jnp.allclose(out, ref, atol=3e-2, rtol=3e-2), float(
        jnp.max(jnp.abs(out - ref)))
    print("KERNEL_OK")
</pallas_src>

<mosaic_0001>
module attributes {stable_mosaic.version = 11 : i64} {
  func.func @_meta_kernel(%arg0: i32, %arg1: memref<32x16xbf16, #tpu.memory_space<vmem>>, %arg2: memref<32x2xi32, #tpu.memory_space<vmem>>, %arg3: memref<16x32xbf16, #tpu.memory_space<vmem>>, %arg4: memref<1x32xf32, #tpu.memory_space<vmem>>, %arg5: memref<32x32xbf16, #tpu.memory_space<vmem>>, %arg6: memref<18x32xbf16, #tpu.memory_space<vmem>>, %arg7: memref<1x32xf32, #tpu.memory_space<vmem>>, %arg8: memref<32x32xf32, #tpu.memory_space<vmem>>) attributes {dimension_semantics = [#tpu.dimension_semantics<parallel>], iteration_bounds = array<i64: 2>, scalar_prefetch = 0 : i64, scratch_operands = 0 : i64, tpu.core_type = #tpu.core_type<tc>, window_params = [{transform_indices = @transform_0, window_bounds = array<i64: 32, 16>}, {transform_indices = @transform_1, window_bounds = array<i64: 32, 2>}, {pipeline_mode = #tpu.pipeline_mode<synchronous>, transform_indices = @transform_2, window_bounds = array<i64: 16, 32>}, {pipeline_mode = #tpu.pipeline_mode<synchronous>, transform_indices = @transform_3, window_bounds = array<i64: 1, 32>}, {pipeline_mode = #tpu.pipeline_mode<synchronous>, transform_indices = @transform_4, window_bounds = array<i64: 32, 32>}, {pipeline_mode = #tpu.pipeline_mode<synchronous>, transform_indices = @transform_5, window_bounds = array<i64: 18, 32>}, {pipeline_mode = #tpu.pipeline_mode<synchronous>, transform_indices = @transform_6, window_bounds = array<i64: 1, 32>}, {transform_indices = @transform_7, window_bounds = array<i64: 32, 32>}]} {
    %c0 = arith.constant 0 : index
    %c0_0 = arith.constant 0 : index
    %0 = vector.load %arg1[%c0, %c0_0] : memref<32x16xbf16, #tpu.memory_space<vmem>>, vector<32x16xbf16>
    %c0_1 = arith.constant 0 : index
    %c0_2 = arith.constant 0 : index
    %1 = vector.load %arg3[%c0_1, %c0_2] : memref<16x32xbf16, #tpu.memory_space<vmem>>, vector<16x32xbf16>
    %cst = arith.constant dense<0.000000e+00> : vector<32x32xf32>
    %2 = tpu.matmul %0, %1, %cst {dimension_numbers = #tpu.dot_dimension_numbers<[1], [0], [0], [1], [0, 0, 1, 1], [], []>} : vector<32x16xbf16>, vector<16x32xbf16>, vector<32x32xf32> -> vector<32x32xf32>
    %c0_3 = arith.constant 0 : index
    %c0_4 = arith.constant 0 : index
    %3 = vector.load %arg4[%c0_3, %c0_4] : memref<1x32xf32, #tpu.memory_space<vmem>>, vector<1x32xf32>
    %4 = vector.broadcast %3 : vector<1x32xf32> to vector<32x32xf32>
    %5 = arith.addf %2, %4 : vector<32x32xf32>
    %cst_5 = arith.constant 0.000000e+00 : f32
    %6 = vector.broadcast %cst_5 : f32 to vector<32x32xf32>
    %7 = arith.maximumf %5, %6 : vector<32x32xf32>
    %c0_6 = arith.constant 0 : index
    %c0_7 = arith.constant 0 : index
    %8 = vector.load %arg2[%c0_6, %c0_7] : memref<32x2xi32, #tpu.memory_space<vmem>>, vector<32x2xi32>
    %9 = tpu.iota {dimensions = array<i32: 1>} : vector<32x18xi32>
    %10 = vector.extract_strided_slice %8 {offsets = [0, 0], sizes = [32, 1], strides = [1, 1]} : vector<32x2xi32> to vector<32x1xi32>
    %c0_i32 = arith.constant 0 : i32
    %11 = vector.broadcast %c0_i32 : i32 to vector<32x1xi32>
    %12 = arith.addi %10, %11 : vector<32x1xi32>
    %13 = vector.broadcast %12 : vector<32x1xi32> to vector<32x18xi32>
    %14 = arith.cmpi eq, %13, %9 : vector<32x18xi32>
    %15 = vector.extract_strided_slice %8 {offsets = [0, 1], sizes = [32, 1], strides = [1, 1]} : vector<32x2xi32> to vector<32x1xi32>
    %c11_i32 = arith.constant 11 : i32
    %16 = vector.broadcast %c11_i32 : i32 to vector<32x1xi32>
    %17 = arith.addi %15, %16 : vector<32x1xi32>
    %18 = vector.broadcast %17 : vector<32x1xi32> to vector<32x18xi32>
    %19 = arith.cmpi eq, %18, %9 : vector<32x18xi32>
    %20 = arith.ori %14, %19 : vector<32x18xi1>
    %cst_8 = arith.constant 1.000000e+00 : f32
    %cst_9 = arith.constant 0.000000e+00 : f32
    %21 = vector.broadcast %cst_8 : f32 to vector<32x18xf32>
    %22 = vector.broadcast %cst_9 : f32 to vector<32x18xf32>
    %23 = arith.select %20, %21, %22 : vector<32x18xi1>, vector<32x18xf32>
    %24 = arith.truncf %23 : vector<32x18xf32> to vector<32x18xbf16>
    %25 = arith.truncf %7 : vector<32x32xf32> to vector<32x32xbf16>
    %c0_10 = arith.constant 0 : index
    %c0_11 = arith.constant 0 : index
    %26 = vector.load %arg5[%c0_10, %c0_11] : memref<32x32xbf16, #tpu.memory_space<vmem>>, vector<32x32xbf16>
    %cst_12 = arith.constant dense<0.000000e+00> : vector<32x32xf32>
    %27 = tpu.matmul %25, %26, %cst_12 {dimension_numbers = #tpu.dot_dimension_numbers<[1], [0], [0], [1], [0, 0, 1, 1], [], []>} : vector<32x32xbf16>, vector<32x32xbf16>, vector<32x32xf32> -> vector<32x32xf32>
    %c0_13 = arith.constant 0 : index
    %c0_14 = arith.constant 0 : index
    %28 = vector.load %arg6[%c0_13, %c0_14] : memref<18x32xbf16, #tpu.memory_space<vmem>>, vector<18x32xbf16>
    %cst_15 = arith.constant dense<0.000000e+00> : vector<32x32xf32>
    %29 = tpu.matmul %24, %28, %cst_15 {dimension_numbers = #tpu.dot_dimension_numbers<[1], [0], [0], [1], [0, 0, 1, 1], [], []>} : vector<32x18xbf16>, vector<18x32xbf16>, vector<32x32xf32> -> vector<32x32xf32>
    %30 = arith.addf %27, %29 : vector<32x32xf32>
    %c0_16 = arith.constant 0 : index
    %c0_17 = arith.constant 0 : index
    %31 = vector.load %arg7[%c0_16, %c0_17] : memref<1x32xf32, #tpu.memory_space<vmem>>, vector<1x32xf32>
    %32 = vector.broadcast %31 : vector<1x32xf32> to vector<32x32xf32>
    %33 = arith.addf %30, %32 : vector<32x32xf32>
    %cst_18 = arith.constant 0.000000e+00 : f32
    %34 = vector.broadcast %cst_18 : f32 to vector<32x32xf32>
    %35 = arith.maximumf %33, %34 : vector<32x32xf32>
    %c0_19 = arith.constant 0 : index
    %c0_20 = arith.constant 0 : index
    %36 = vector.load %arg8[%c0_19, %c0_20] : memref<32x32xf32, #tpu.memory_space<vmem>>, vector<32x32xf32>
    tpu.vector_store %arg8[%c0_19, %c0_20], %35 {strides = array<i32>} : memref<32x32xf32, #tpu.memory_space<vmem>>, vector<32x32xf32>,
    return
  }
  func.func @transform_0(%arg0: i32) -> (i32, i32) {
    %c0_i32 = arith.constant 0 : i32
    %c0_i32_0 = arith.constant 0 : i32
    return %arg0, %c0_i32 : i32, i32
  }
  func.func @transform_1(%arg0: i32) -> (i32, i32) {
    %c0_i32 = arith.constant 0 : i32
    %c0_i32_0 = arith.constant 0 : i32
    return %arg0, %c0_i32 : i32, i32
  }
  func.func @transform_2(%arg0: i32) -> (i32, i32) {
    %c0_i32 = arith.constant 0 : i32
    %c0_i32_0 = arith.constant 0 : i32
    %c0_i32_1 = arith.constant 0 : i32
    return %c0_i32, %c0_i32_0 : i32, i32
  }
  func.func @transform_3(%arg0: i32) -> (i32, i32) {
    %c0_i32 = arith.constant 0 : i32
    %c0_i32_0 = arith.constant 0 : i32
    %c0_i32_1 = arith.constant 0 : i32
    return %c0_i32, %c0_i32_0 : i32, i32
  }
  func.func @transform_4(%arg0: i32) -> (i32, i32) {
    %c0_i32 = arith.constant 0 : i32
    %c0_i32_0 = arith.constant 0 : i32
    %c0_i32_1 = arith.constant 0 : i32
    return %c0_i32, %c0_i32_0 : i32, i32
  }
  func.func @transform_5(%arg0: i32) -> (i32, i32) {
    %c0_i32 = arith.constant 0 : i32
    %c0_i32_0 = arith.constant 0 : i32
    %c0_i32_1 = arith.constant 0 : i32
    return %c0_i32, %c0_i32_0 : i32, i32
  }
  func.func @transform_6(%arg0: i32) -> (i32, i32) {
    %c0_i32 = arith.constant 0 : i32
    %c0_i32_0 = arith.constant 0 : i32
    %c0_i32_1 = arith.constant 0 : i32
    return %c0_i32, %c0_i32_0 : i32, i32
  }
  func.func @transform_7(%arg0: i32) -> (i32, i32) {
    %c0_i32 = arith.constant 0 : i32
    %c0_i32_0 = arith.constant 0 : i32
    return %arg0, %c0_i32 : i32, i32
  }
}

</mosaic_0001>

<bundles_post_ra>
// kernel: meta_model_pallas.1
= control target key start
LH: loop header
LB: loop body
LE: loop exit
PB: predicated region body
PF: predicated region fallthrough
CT: control target
= control target key end

     0   :  { %s814_s24 = smov 0   ;;  %s869_s0 = inlined_call_operand.vmem [shape: bf16[64,16], index: 0, kind: input, shape index: {}]   ;;  %s870_s1 = inlined_call_operand.vmem [shape: s32[64,2], index: 1, kind: input, shape index: {}]   ;;  %s871_s2 = inlined_call_operand.vmem [shape: bf16[16,32], index: 2, kind: input, shape index: {}]   ;;  %s872_s3 = inlined_call_operand.vmem [shape: f32[1,32], index: 3, kind: input, shape index: {}]   ;;  %s873_s4 = inlined_call_operand.vmem [shape: bf16[32,32], index: 4, kind: input, shape index: {}]   ;;  %s874_s5 = inlined_call_operand.vmem [shape: bf16[18,32], index: 5, kind: input, shape index: {}]   ;;  %s875_s6 = inlined_call_operand.vmem [shape: f32[1,32], index: 6, kind: input, shape index: {}]   ;;  %s876_s7 = inlined_call_operand.vmem [shape: f32[64,32], index: 7, kind: output, shape index: {}]  }
   0x1 LB: > { %s679_s25 = sadd.s32 4294967295, %s769_s24   ;;  %p683_p0 = scmp.ge.s32.totalorder %s769_s24, 1  ;;  %s769_s24 = sphi %s814_s24, %s17_s24  }
   0x2   : > { %p249_p1 = scmp.lt.s32.totalorder %s769_s24, 3 }
   0x4   : > { %p250_p2 = pnand %p683_p0, %p249_p1 }
   0x5   : > { %s684_s28 = sshll.u32 (!%p250_p2), %s679_s25, 2 }
   0x6   : > { %253 = sbr.rel (%p250_p2) target bundleno = 428 (0x1ac), region = 48  ;;  %p287_p3 = scmp.lt.s32.totalorder (!%p250_p2), %s684_s28, 7 }
   0xb   : > { %v756_v0 = vld [vmem:[%s871_s2] sm:$0xff]   ;;  %v771_v1 = vmov 0   ;;  %s878_s28 = smov (!%p287_p3, %s684_s28), 7  ;;  %vm334_vm0 = vcmask 130048   ;;  %v772_v8 = vmov 1   ;;  %vm471_vm1 = vcmask 1040384  }
   0xc   : > { %718 = vmatprep.subr.bf16.mxu0 %v756_v0  ;;  %753 = vset.pattern.permute.xlu1 %v771_v1  ;;  %s685_s29 = sshll.u32 %s878_s28, 2  ;;  %s687_s30 = sshll.u32 %s878_s28, 3  ;;  %v759_v11 = vld [vmem:[%s874_s5 + $0x8] ss:$0 sps:$4 sm:$0x11]   ;;  %v760_v15 = vld [vmem:[%s874_s5] sm:$0xff]   ;;  %v398_v18 = vlaneseq }
   0xd   : > { %719 = vmatpush3.bf16.msra.mxu0 %v756_v0  ;;  %752 = vset.pattern.permute.xlu0 %v771_v1  ;;  %s290_s10 = scalar_lea.vmem %s869_s0, %s685_s29  ;;  %s296_s13 = scalar_lea.vmem %s870_s1, %s687_s30  ;;  %v473_v12 = vsel %vm471_vm1, %v759_v11, 0  ;;  %v761_v16 = vld [vmem:[%s873_s4 + $0x8] sm:$0xff]   ;;  %v762_v17 = vld [vmem:[%s873_s4] sm:$0xff]   ;;  %v773_v26 = vmov 0.0   ;;  %vm464_vm9 = vcmask 146432   ;;  %vm536_vm15 = vcmask 261120  }
   0xe   : > { %v757_v2 = vld [vmem:[%s290_s10] sm:$0xff]   ;;  %v758_v3 = vld [vmem:[%s290_s10 + $0x8] sm:$0xff]   ;;  %v397_v4 = vld [vmem:[%s296_s13 + $0x18] sm:$0xff]  ;;  %740 = vmatprep.subr.msk.bf16.mxu1 %vm471_vm1, %v759_v11  ;;  %732 = vmatprep.subr.bf16.mxu0 %v761_v16  ;;  %v399_v19 = vand.u32 127, %v398_v18  ;;  %s302_s8 = scalar_lea.vmem %s876_s7, %s687_s30 }
   0xf   : > { %720 = vmatprep.mubr.msk.bf16.mxu0 %vm334_vm0, %v757_v2  ;;  %v394_v5 = vld [vmem:[%s296_s13] sm:$0xff]  ;;  %410 = vperm.xlu1 %753, %v397_v4   ;;  %v395_v7 = vld [vmem:[%s296_s13 + $0x8] sm:$0xff]  ;;  %v396_v10 = vld [vmem:[%s296_s13 + $0x10] sm:$0xff]  ;;  %v419_v13 = vadd.s32 11, %v397_v4 }
  0x10   : > { %721 = vmatmul.mubr.msk.bf16.vlgmr.msra.gmra.mxu0 %vm334_vm0, %v758_v3  ;;  %401 = vperm.xlu0 %752, %v394_v5   ;;  %v416_v6 = vadd.s32 11, %v394_v5  ;;  %v417_v9 = vadd.s32 11, %v395_v7  ;;  %v418_v14 = vadd.s32 11, %v396_v10  ;;  %v690_v37 = vld [vmem:[%s872_s3] ss:$0 sm:$0xff] }
  0x11   : > { %725 = vmatpush3.bf16.msra.mxu1 %v473_v12  ;;  %733 = vmatpush3.bf16.msra.mxu0 %v761_v16  ;;  %v704_v57 = vld [vmem:[%s875_s6] ss:$0 sm:$0xff] }
  0x12   : > { %726 = vmatprep.subr.bf16.mxu1 %v760_v15  ;;  %734 = vmatprep.subr.bf16.mxu0 %v762_v17 }
  0x13   : > { %754 = vset.pattern.permute.xlu1 %v772_v8 }
  0x14   : > { %404 = vperm.xlu0 %752, %v395_v7   ;;  %421 = vperm.xlu1 %754, %v416_v6  }
  0x15   : > { %727 = vmatpush3.bf16.msra.mxu1 %v760_v15  ;;  %735 = vmatpush3.bf16.msra.mxu0 %v762_v17 }
  0x18   : > { %407 = vperm.xlu0 %752, %v396_v10   ;;  %424 = vperm.xlu1 %754, %v417_v9  }
  0x1c   : > { %755 = vset.pattern.permute.xlu0 %v772_v8  ;;  %430 = vperm.xlu1 %754, %v419_v13  }
  0x1d   : > { %427 = vperm.xlu0 %755, %v418_v14  }
  0x8a   : > { %v411_v20 = vpop.permute.xlu1 %410 }
  0x8b   : > { %v402_v21 = vpop.permute.xlu0 %401  ;;  %vm415_vm8 = vcmp.eq.s32.totalorder %v411_v20, %v399_v19 }
  0x8c   : > { %vm412_vm2 = vcmp.eq.s32.totalorder %v402_v21, %v399_v19 }
  0x8f   : > { %v405_v22 = vpop.permute.xlu0 %404  ;;  %v422_v23 = vpop.permute.xlu1 %421 }
  0x90   : > { %vm432_vm3 = vcmp.eq.s32.totalorder %v422_v23, %v399_v19  ;;  %vm413_vm5 = vcmp.eq.s32.totalorder %v405_v22, %v399_v19 }
  0x91   : > { %vm436_vm4 = vmor %vm412_vm2, %vm432_vm3 }
  0x92   : > { %v440_v27 = vsel %vm436_vm4, 1.0, %v773_v26 }
  0x93   : > { %v408_v24 = vpop.permute.xlu0 %407  ;;  %v425_v25 = vpop.permute.xlu1 %424 }
  0x94   : > { %vm433_vm6 = vcmp.eq.s32.totalorder %v425_v25, %v399_v19  ;;  %vm414_vm10 = vcmp.eq.s32.totalorder %v408_v24, %v399_v19 }
  0x95   : > { %vm437_vm7 = vmor %vm413_vm5, %vm433_vm6 }
  0x96   : > { %v441_v28 = vsel %vm437_vm7, 1.0, %v773_v26 }
  0x97   : > { %v431_v29 = vpop.permute.xlu1 %430  ;;  %v444_v30 = vpack.c.bf16 %v441_v28, %v440_v27 }
  0x98   : > { %v428_v31 = vpop.permute.xlu0 %427  ;;  %vm435_vm11 = vcmp.eq.s32.totalorder %v431_v29, %v399_v19 }
  0x99   : > { %vm434_vm12 = vcmp.eq.s32.totalorder %v428_v31, %v399_v19  ;;  %vm439_vm13 = vmor %vm415_vm8, %vm435_vm11  ;;  %728 = vmatprep.mubr.msk.bf16.mxu1 %vm464_vm9, %v444_v30 }
  0x9a   : > { %vm438_vm14 = vmor %vm414_vm10, %vm434_vm12  ;;  %v443_v32 = vsel %vm439_vm13, 1.0, %v773_v26 }
  0x9b   : > { %v442_v33 = vsel %vm438_vm14, 1.0, %v773_v26 }
  0x9c   : > { %v445_v34 = vpack.c.bf16 %v443_v32, %v442_v33 }
  0x9e   : > { %729 = vmatmul.mubr.msk.bf16.vlgmr.msra.gmra.mxu1 %vm464_vm9, %v445_v34 }
  0xd0   : > { %v722_v35 = vpop.f32.mrf.mxu0 }
  0xd1   : > { %v384_v41 = vadd.f32 %v722_v35, %v690_v37 }
  0xd2   : > { %v375_v36 = vpop.f32.mrf.mxu0 }
  0xd3   : > { %v376_v39 = vadd.f32 %v690_v37, %v375_v36  ;;  %v392_v47 = vmax.f32 %v384_v41, 0.0 }
  0xd4   : > { %v723_v38 = vpop.f32.mrf.mxu0 }
  0xd5   : > { %v387_v40 = vadd.f32 %v723_v38, %v690_v37  ;;  %v390_v45 = vmax.f32 %v376_v39, 0.0 }
  0xd6   : > { %v378_v42 = vpop.f32.mrf.mxu0 }
  0xd7   : > { %v379_v43 = vadd.f32 %v690_v37, %v378_v42  ;;  %v393_v44 = vmax.f32 %v387_v40, 0.0 }
  0xd9   : > { %v391_v46 = vmax.f32 %v379_v43, 0.0  ;;  %v447_v49 = vpack.c.bf16 %v393_v44, %v392_v47 }
  0xdb   : > { %v446_v48 = vpack.c.bf16 %v391_v46, %v390_v45 }
  0xdd   : > { %736 = vmatprep.mubr.msk.bf16.mxu0 %vm536_vm15, %v446_v48 }
  0xde   : > { %737 = vmatmul.mubr.msk.bf16.vlgmr.msra.gmra.mxu0 %vm536_vm15, %v447_v49 }
 0x15e   : > { %v730_v50 = vpop.f32.mrf.mxu1 }
 0x160   : > { %v509_v51 = vpop.f32.mrf.mxu1 }
 0x162   : > { %v731_v53 = vpop.f32.mrf.mxu1 }
 0x164   : > { %v512_v61 = vpop.f32.mrf.mxu1 }
 0x19e   : > { %v738_v52 = vpop.f32.mrf.mxu0 }
 0x19f   : > { %v586_v56 = vadd.f32 %v738_v52, %v730_v50 }
 0x1a0   : > { %v577_v54 = vpop.f32.mrf.mxu0 }
 0x1a1   : > { %v578_v55 = vadd.f32 %v577_v54, %v509_v51  ;;  %v601_v1 = vadd.f32 %v704_v57, %v586_v56 }
 0x1a2   : > { %v739_v58 = vpop.f32.mrf.mxu0 }
 0x1a3   : > { %v599_v59 = vadd.f32 %v704_v57, %v578_v55  ;;  %v589_v60 = vadd.f32 %v739_v58, %v731_v53  ;;  %v605_v5 = vmax.f32 %v601_v1, 0.0 }
 0x1a4   : > { %v580_v62 = vpop.f32.mrf.mxu0 }
 0x1a5   : > { %v603_v63 = vmax.f32 %v599_v59, 0.0  ;;  %v581_v0 = vadd.f32 %v580_v62, %v512_v61  ;;  %v602_v2 = vadd.f32 %v704_v57, %v589_v60  ;;  %609 = vst.msk [vmem:[%s302_s8 + $0x10] sm:$0xff] %vm536_vm15, %v605_v5 }
 0x1a7   : > { %607 = vst.msk [vmem:[%s302_s8] sm:$0xff] %vm536_vm15, %v603_v63  ;;  %v600_v3 = vadd.f32 %v704_v57, %v581_v0  ;;  %v606_v6 = vmax.f32 %v602_v2, 0.0 }
 0x1a9   : > { %v604_v4 = vmax.f32 %v600_v3, 0.0  ;;  %610 = vst.msk [vmem:[%s302_s8 + $0x18] sm:$0xff] %vm536_vm15, %v606_v6 }
 0x1ab   : > { %608 = vst.msk [vmem:[%s302_s8 + $0x8] sm:$0xff] %vm536_vm15, %v604_v4 }
 0x1ac PF: > { %s17_s24 = sadd.s32 1, %s769_s24  }
 0x1ad   : > { %p14_p4 = scmp.ge.s32.totalorder %s17_s24, 4  }
 0x1af   :  { %16 = sbr.rel (!%p14_p4) target bundleno = 1 (0x1), region = 81 }

</bundles_post_ra>
